<compile_context>
chip_gen: v7x
topology: tpu7x:2x2x1
jax: 0.10.0
libtpu: 0.0.40
codegen_flags: <defaults>
</compile_context>

<pallas_src>
import jax
import jax.numpy as jnp
from jax.experimental import pallas as pl
from jax.experimental.pallas import tpu as pltpu

LN_EPS = 1e-5  # torch.nn.LayerNorm default


def _layer_norm(x, gamma, beta):
    mu = jnp.mean(x, axis=-1, keepdims=True)
    var = jnp.mean((x - mu) ** 2, axis=-1, keepdims=True)
    return (x - mu) * jax.lax.rsqrt(var + LN_EPS) * gamma + beta


def tn_prologue_kernel(r_ref, ep_ref, eq_ref,
                       gr_ref, br_ref, ge_ref, be_ref,
                       c0_ref, cp_ref, cq_ref,
                       w_ref):
    """Single-invocation kernel: LayerNorms + TN rank contraction -> w [B, Rm].

    r_ref  : [B, d_r]          raw relation embeddings (pre-LayerNorm)
    ep_ref : [B, d_e]          raw entity embedding, first present node
    eq_ref : [B, d_e]          raw entity embedding, second present node
    c0_ref : [d_r, Rp*Rq*Rm]   relation core, rank axes permuted (miss-axis last)
    cp_ref : [d_e, Rp]         core of the first present entity node
    cq_ref : [d_e, Rq]         core of the second present entity node
    w_ref  : [B, Rm]           output: contraction result on the missing-node rank axis
    """
    rn = _layer_norm(r_ref[...], gr_ref[...], br_ref[...])        # [B, d_r]
    epn = _layer_norm(ep_ref[...], ge_ref[...], be_ref[...])      # [B, d_e]
    eqn = _layer_norm(eq_ref[...], ge_ref[...], be_ref[...])      # [B, d_e]

    u_p = jnp.dot(epn, cp_ref[...], preferred_element_type=jnp.float32)   # [B, Rp]
    u_q = jnp.dot(eqn, cq_ref[...], preferred_element_type=jnp.float32)   # [B, Rq]
    t = jnp.dot(rn, c0_ref[...], preferred_element_type=jnp.float32)      # [B, Rp*Rq*Rm]

    B = r_ref.shape[0]
    Rp = cp_ref.shape[1]
    Rq = cq_ref.shape[1]
    Rm = w_ref.shape[1]

    # Small unrolled rank contractions.  Runs exactly ONCE per forward; the
    # handful of sub-128-lane slices is negligible at rank ~8.
    s = jnp.zeros((B, Rq * Rm), jnp.float32)
    for e in range(Rp):
        s = s + u_p[:, e:e + 1] * t[:, e * Rq * Rm:(e + 1) * Rq * Rm]
    w = jnp.zeros((B, Rm), jnp.float32)
    for f in range(Rq):
        w = w + u_q[:, f:f + 1] * s[:, f * Rm:(f + 1) * Rm]
    w_ref[...] = w


def logits_kernel(w_ref, pT_ref, out_ref):
    """One grid step: [B, Rm] @ [Rm, TILE_N] -> [B, TILE_N] logits slab.

    Accumulation is always f32 on the MXU regardless of the stream dtype.
    NOTE: when N % tile != 0 the padded P^T columns of the last block contain
    stale VMEM; the corresponding output columns are discarded on partial
    writeback, so this is functionally fine -- do not change out_specs to a
    full-array block without also masking here.
    """
    out_ref[...] = jnp.dot(w_ref[...], pT_ref[...],
                           preferred_element_type=jnp.float32).astype(out_ref.dtype)


def _vmem_budget_bytes():
    """Per-generation VMEM budget (~78% of physical capacity)."""
    try:
        cap = int(pltpu.get_tpu_info().vmem_capacity_bytes)   # 64 MiB v7x, 128 MiB v5e/v6e
    except Exception:
        cap = 64 << 20                                         # safest lower bound (v7x)
    return int(cap * 0.78)


def prepare_params(params):
    """One-time parameter prep (NOT per forward).

    Algebraic reassociation: (w @ core_v^T) @ E^T == w @ (E @ core_v)^T, so we
    fold each entity core into the entity table once and stream P_v^T [R, N]
    instead of E^T [d_e, N].  Stored in f32 and bf16 (bf16 is the default
    stream dtype).
    # A further option (not enabled): quantize P^T to int8 (v5e/v6e MXU) or
    # fp8-e4m3 (v7x MXU) with per-column scales applied in the kernel epilogue.
    """
    p = dict(params)
    E = params["E"]
    cores = params["cores"]
    P_T = {v: jnp.asarray((E @ cores[v]).T) for v in (1, 2, 3)}   # each [R, N]
    p["P_T"] = P_T
    p["P_T_bf16"] = {v: t.astype(jnp.bfloat16) for v, t in P_T.items()}
    return p


def tn_model_forward(params, r_idx, e_idx, miss, *, tile_n=8192,
                     stream_dtype=jnp.bfloat16, out_dtype=jnp.float32):
    """JAX wrapper mirroring TNModel.forward (star graph, arity=3, eval mode).

    tile_n       : requested entity-axis tile width (multiple of 128); the
                   effective tile is additionally capped by the VMEM budget
                   and by the >=2-grid-step (megacore) rule.
    stream_dtype : dtype in which w and P_miss^T stream through the GEMM
                   (default bf16: halves the dominant HBM stream; MXU
                   accumulation stays f32).
    out_dtype    : logits dtype.  bf16 halves the [B, N] writeback stream if
                   downstream tolerates it; default f32 matches the reference.
    """
    E_w, R_w = params["E"], params["R"]
    cores = list(params["cores"])
    core0 = cores[0]

    # Embedding gather (glue).
    r_raw = R_w[r_idx]                                   # [B, d_r]
    present = [v for v in (1, 2, 3) if v != miss]
    p, q = present
    ep_raw = E_w[e_idx[p - 1]]                           # [B, d_e]
    eq_raw = E_w[e_idx[q - 1]]                           # [B, d_e]

    # Permute core0 rank axes so the missing-node axis is last, then flatten.
    core0_perm = jnp.transpose(core0, (0, p, q, miss))
    d_r = core0.shape[0]
    Rp, Rq, Rm = core0_perm.shape[1:]
    core0_2d = core0_perm.reshape(d_r, Rp * Rq * Rm)
    core_p = cores[p]                                    # [d_e, Rp]
    core_q = cores[q]                                    # [d_e, Rq]

    B = r_raw.shape[0]
    N, d_e = E_w.shape

    # --- stage 1: grid-invariant prologue, computed exactly once ------------
    w = pl.pallas_call(
        tn_prologue_kernel,
        out_shape=jax.ShapeDtypeStruct((B, Rm), jnp.float32),
    )(r_raw, ep_raw, eq_raw,
      params["ln_r_g"].reshape(1, -1), params["ln_r_b"].reshape(1, -1),
      params["ln_e_g"].reshape(1, -1), params["ln_e_b"].reshape(1, -1),
      core0_2d, core_p, core_q)

    # --- stage 2: bandwidth-bound logits GEMM over entity tiles -------------
    sdt = jnp.dtype(stream_dtype)
    out_dt = jnp.dtype(out_dtype)
    if sdt == jnp.dtype(jnp.bfloat16):
        P_T = params.get("P_T_bf16", {}).get(miss)
    else:
        P_T = params.get("P_T", {}).get(miss)
    if P_T is None:
        P_T = (E_w @ cores[miss]).T.astype(sdt)          # [Rm, N] fallback
    w_s = w.astype(sdt)

    # Tile width derived from a per-generation VMEM budget (double-buffered
    # P^T tile + double-buffered out tile), then capped so the entity grid has
    # at least 2 lane-dense steps (engages both v7x TensorCores via the
    # "parallel" dimension semantics; harmless on single-TC v5e/v6e).
    budget = _vmem_budget_bytes()
    per_col = 2 * (Rm * sdt.itemsize + B * out_dt.itemsize)
    tile_cap = max(128, (budget // max(per_col, 1)) // 128 * 128)
    if N <= 128:
        tile = N                                         # full-dim block (always legal)
    else:
        tile = max(128, min(int(tile_n), tile_cap) // 128 * 128)
        two_step = max(128, (-(-N // 2)) // 128 * 128)   # round_down(cdiv(N,2), 128)
        tile = min(tile, two_step)

    need = 2 * tile * (Rm * sdt.itemsize + B * out_dt.itemsize) \
        + 2 * B * Rm * sdt.itemsize
    vmem_limit = int(min(budget, max(4 * need, 16 << 20)))

    # NOTE: with B=8 the MXU rows are heavily under-utilized; batching more
    # queries per call (B of 64-128) amortizes the P^T stream linearly and is
    # the largest caller-side lever.  The kernel is HBM-bound regardless.
    logits = pl.pallas_call(
        logits_kernel,
        out_shape=jax.ShapeDtypeStruct((B, N), out_dt),
        grid_spec=pltpu.PrefetchScalarGridSpec(
            num_scalar_prefetch=0,
            grid=(pl.cdiv(N, tile),),
            in_specs=[
                pl.BlockSpec((B, Rm), lambda i: (0, 0)),      # resident w (tiny)
                pl.BlockSpec((Rm, tile), lambda i: (0, i)),   # streamed P_miss^T tile
            ],
            out_specs=pl.BlockSpec((B, tile), lambda i: (0, i)),
        ),
        compiler_params=pltpu.CompilerParams(
            dimension_semantics=("parallel",),
            vmem_limit_bytes=vmem_limit),
    )(w_s, P_T)

    # TODO(synk): nn.Dropout(hidden_dropout) is eval-mode identity here.
    return logits


def reference_forward(params, r_idx, e_idx, miss):
    """Pure-JAX port of TNModel.forward for correctness checking."""
    E_w, R_w = params["E"], params["R"]
    r = _layer_norm(R_w[r_idx], params["ln_r_g"], params["ln_r_b"])
    es = [_layer_norm(E_w[idx], params["ln_e_g"], params["ln_e_b"])
          for i, idx in enumerate(e_idx, start=1) if i != miss]
    node_letter = {0: 'a', 1: 'b', 2: 'c', 3: 'd'}
    subs = ['aefg', 'be', 'cf', 'dg']
    embed_letters = ['...a'] + ['...' + node_letter[v] for v in (1, 2, 3) if v != miss]
    eq = ','.join(subs + embed_letters) + '->...' + node_letter[miss]
    raw = jnp.einsum(eq, *params["cores"], r, *es)
    return raw @ E_w.T


def init_params(key, num_entities, num_relations, d_e, d_r, rank):
    ks = jax.random.split(key, 6)
    E = jax.random.uniform(ks[0], (num_entities, d_e), jnp.float32, -0.1, 0.1)
    R = jax.random.uniform(ks[1], (num_relations, d_r), jnp.float32, -0.1, 0.1)
    core0 = jax.random.normal(ks[2], (d_r, rank, rank, rank), jnp.float32) * 1e-3
    core1 = jax.random.normal(ks[3], (d_e, rank), jnp.float32) * 1e-3
    core2 = jax.random.normal(ks[4], (d_e, rank), jnp.float32) * 1e-3
    core3 = jax.random.normal(ks[5], (d_e, rank), jnp.float32) * 1e-3
    return dict(
        E=E, R=R,
        ln_e_g=jnp.ones((d_e,), jnp.float32), ln_e_b=jnp.zeros((d_e,), jnp.float32),
        ln_r_g=jnp.ones((d_r,), jnp.float32), ln_r_b=jnp.zeros((d_r,), jnp.float32),
        cores=[core0, core1, core2, core3],
    )


if __name__ == "__main__":
    num_entities, num_relations = 256, 16
    d_e = d_r = 32
    rank = 8
    batch = 8
    arity = 3
    miss = 3

    key = jax.random.PRNGKey(0)
    pkey, ikey = jax.random.split(key)
    params = prepare_params(
        init_params(pkey, num_entities, num_relations, d_e, d_r, rank))

    k_r, k_e = jax.random.split(ikey)
    r_idx = jax.random.randint(k_r, (batch,), 0, num_relations)
    e_idx = [jax.random.randint(jax.random.fold_in(k_e, i), (batch,), 0, num_entities)
             for i in range(arity)]

    ref = reference_forward(params, r_idx, e_idx, miss)
    scale = float(jnp.max(jnp.abs(ref)))

    # f32 streaming: validates the reassociated (P_miss^T) GEMM exactly.
    logits_f32 = jax.block_until_ready(
        tn_model_forward(params, r_idx, e_idx, miss, stream_dtype=jnp.float32))
    assert logits_f32.shape == (batch, num_entities), logits_f32.shape
    err_f32 = float(jnp.max(jnp.abs(logits_f32 - ref)))
    assert err_f32 <= 1e-4 * scale + 1e-30, (err_f32, scale)

    # Default path: bf16 stream of w / P_miss^T with f32 MXU accumulation
    # (halves the dominant HBM stream).  N=256 -> tile=128, 2-step parallel grid.
    logits_bf16 = jax.block_until_ready(
        tn_model_forward(params, r_idx, e_idx, miss))
    err_bf16 = float(jnp.max(jnp.abs(logits_bf16.astype(jnp.float32) - ref)))
    assert err_bf16 <= 1e-2 * scale + 1e-30, (err_bf16, scale)

    # bf16 logits output (halves the [B, N] writeback stream as well).
    logits_bf16_out = jax.block_until_ready(
        tn_model_forward(params, r_idx, e_idx, miss, out_dtype=jnp.bfloat16))
    err_out = float(jnp.max(jnp.abs(logits_bf16_out.astype(jnp.float32) - ref)))
    assert err_out <= 1.5e-2 * scale + 1e-30, (err_out, scale)

    print("KERNEL_OK")
</pallas_src>

<mosaic_0001>
module attributes {stable_mosaic.version = 11 : i64} {
  func.func @tn_prologue_kernel(%arg0: memref<8x32xf32, #tpu.memory_space<vmem>>, %arg1: memref<8x32xf32, #tpu.memory_space<vmem>>, %arg2: memref<8x32xf32, #tpu.memory_space<vmem>>, %arg3: memref<1x32xf32, #tpu.memory_space<vmem>>, %arg4: memref<1x32xf32, #tpu.memory_space<vmem>>, %arg5: memref<1x32xf32, #tpu.memory_space<vmem>>, %arg6: memref<1x32xf32, #tpu.memory_space<vmem>>, %arg7: memref<32x512xf32, #tpu.memory_space<vmem>>, %arg8: memref<32x8xf32, #tpu.memory_space<vmem>>, %arg9: memref<32x8xf32, #tpu.memory_space<vmem>>, %arg10: memref<8x8xf32, #tpu.memory_space<vmem>>) attributes {dimension_semantics = [], scalar_prefetch = 0 : i64, scratch_operands = 0 : i64, tpu.core_type = #tpu.core_type<tc>} {
    %c0 = arith.constant 0 : index
    %c0_0 = arith.constant 0 : index
    %0 = vector.load %arg0[%c0, %c0_0] : memref<8x32xf32, #tpu.memory_space<vmem>>, vector<8x32xf32>
    %c0_1 = arith.constant 0 : index
    %c0_2 = arith.constant 0 : index
    %1 = vector.load %arg3[%c0_1, %c0_2] : memref<1x32xf32, #tpu.memory_space<vmem>>, vector<1x32xf32>
    %c0_3 = arith.constant 0 : index
    %c0_4 = arith.constant 0 : index
    %2 = vector.load %arg4[%c0_3, %c0_4] : memref<1x32xf32, #tpu.memory_space<vmem>>, vector<1x32xf32>
    %cst = arith.constant dense<0.000000e+00> : vector<8xf32>
    %3 = vector.multi_reduction <add>, %0, %cst [1] : vector<8x32xf32> to vector<8xf32>
    %4 = vector.shape_cast %3 : vector<8xf32> to vector<8x1xf32>
    %cst_5 = arith.constant 3.200000e+01 : f32
    %5 = vector.broadcast %cst_5 : f32 to vector<8x1xf32>
    %6 = arith.divf %4, %5 : vector<8x1xf32>
    %7 = vector.broadcast %6 : vector<8x1xf32> to vector<8x32xf32>
    %8 = arith.subf %0, %7 : vector<8x32xf32>
    %9 = arith.mulf %8, %8 : vector<8x32xf32>
    %cst_6 = arith.constant dense<0.000000e+00> : vector<8xf32>
    %10 = vector.multi_reduction <add>, %9, %cst_6 [1] : vector<8x32xf32> to vector<8xf32>
    %11 = vector.shape_cast %10 : vector<8xf32> to vector<8x1xf32>
    %cst_7 = arith.constant 3.200000e+01 : f32
    %12 = vector.broadcast %cst_7 : f32 to vector<8x1xf32>
    %13 = arith.divf %11, %12 : vector<8x1xf32>
    %14 = vector.broadcast %6 : vector<8x1xf32> to vector<8x32xf32>
    %15 = arith.subf %0, %14 : vector<8x32xf32>
    %cst_8 = arith.constant 9.99999974E-6 : f32
    %16 = vector.broadcast %cst_8 : f32 to vector<8x1xf32>
    %17 = arith.addf %13, %16 : vector<8x1xf32>
    %18 = math.rsqrt %17 : vector<8x1xf32>
    %19 = vector.broadcast %18 : vector<8x1xf32> to vector<8x32xf32>
    %20 = arith.mulf %15, %19 : vector<8x32xf32>
    %21 = vector.broadcast %1 : vector<1x32xf32> to vector<8x32xf32>
    %22 = arith.mulf %20, %21 : vector<8x32xf32>
    %23 = vector.broadcast %2 : vector<1x32xf32> to vector<8x32xf32>
    %24 = arith.addf %22, %23 : vector<8x32xf32>
    %c0_9 = arith.constant 0 : index
    %c0_10 = arith.constant 0 : index
    %25 = vector.load %arg1[%c0_9, %c0_10] : memref<8x32xf32, #tpu.memory_space<vmem>>, vector<8x32xf32>
    %c0_11 = arith.constant 0 : index
    %c0_12 = arith.constant 0 : index
    %26 = vector.load %arg5[%c0_11, %c0_12] : memref<1x32xf32, #tpu.memory_space<vmem>>, vector<1x32xf32>
    %c0_13 = arith.constant 0 : index
    %c0_14 = arith.constant 0 : index
    %27 = vector.load %arg6[%c0_13, %c0_14] : memref<1x32xf32, #tpu.memory_space<vmem>>, vector<1x32xf32>
    %cst_15 = arith.constant dense<0.000000e+00> : vector<8xf32>
    %28 = vector.multi_reduction <add>, %25, %cst_15 [1] : vector<8x32xf32> to vector<8xf32>
    %29 = vector.shape_cast %28 : vector<8xf32> to vector<8x1xf32>
    %cst_16 = arith.constant 3.200000e+01 : f32
    %30 = vector.broadcast %cst_16 : f32 to vector<8x1xf32>
    %31 = arith.divf %29, %30 : vector<8x1xf32>
    %32 = vector.broadcast %31 : vector<8x1xf32> to vector<8x32xf32>
    %33 = arith.subf %25, %32 : vector<8x32xf32>
    %34 = arith.mulf %33, %33 : vector<8x32xf32>
    %cst_17 = arith.constant dense<0.000000e+00> : vector<8xf32>
    %35 = vector.multi_reduction <add>, %34, %cst_17 [1] : vector<8x32xf32> to vector<8xf32>
    %36 = vector.shape_cast %35 : vector<8xf32> to vector<8x1xf32>
    %cst_18 = arith.constant 3.200000e+01 : f32
    %37 = vector.broadcast %cst_18 : f32 to vector<8x1xf32>
    %38 = arith.divf %36, %37 : vector<8x1xf32>
    %39 = vector.broadcast %31 : vector<8x1xf32> to vector<8x32xf32>
    %40 = arith.subf %25, %39 : vector<8x32xf32>
    %cst_19 = arith.constant 9.99999974E-6 : f32
    %41 = vector.broadcast %cst_19 : f32 to vector<8x1xf32>
    %42 = arith.addf %38, %41 : vector<8x1xf32>
    %43 = math.rsqrt %42 : vector<8x1xf32>
    %44 = vector.broadcast %43 : vector<8x1xf32> to vector<8x32xf32>
    %45 = arith.mulf %40, %44 : vector<8x32xf32>
    %46 = vector.broadcast %26 : vector<1x32xf32> to vector<8x32xf32>
    %47 = arith.mulf %45, %46 : vector<8x32xf32>
    %48 = vector.broadcast %27 : vector<1x32xf32> to vector<8x32xf32>
    %49 = arith.addf %47, %48 : vector<8x32xf32>
    %c0_20 = arith.constant 0 : index
    %c0_21 = arith.constant 0 : index
    %50 = vector.load %arg2[%c0_20, %c0_21] : memref<8x32xf32, #tpu.memory_space<vmem>>, vector<8x32xf32>
    %c0_22 = arith.constant 0 : index
    %c0_23 = arith.constant 0 : index
    %51 = vector.load %arg5[%c0_22, %c0_23] : memref<1x32xf32, #tpu.memory_space<vmem>>, vector<1x32xf32>
    %c0_24 = arith.constant 0 : index
    %c0_25 = arith.constant 0 : index
    %52 = vector.load %arg6[%c0_24, %c0_25] : memref<1x32xf32, #tpu.memory_space<vmem>>, vector<1x32xf32>
    %cst_26 = arith.constant dense<0.000000e+00> : vector<8xf32>
    %53 = vector.multi_reduction <add>, %50, %cst_26 [1] : vector<8x32xf32> to vector<8xf32>
    %54 = vector.shape_cast %53 : vector<8xf32> to vector<8x1xf32>
    %cst_27 = arith.constant 3.200000e+01 : f32
    %55 = vector.broadcast %cst_27 : f32 to vector<8x1xf32>
    %56 = arith.divf %54, %55 : vector<8x1xf32>
    %57 = vector.broadcast %56 : vector<8x1xf32> to vector<8x32xf32>
    %58 = arith.subf %50, %57 : vector<8x32xf32>
    %59 = arith.mulf %58, %58 : vector<8x32xf32>
    %cst_28 = arith.constant dense<0.000000e+00> : vector<8xf32>
    %60 = vector.multi_reduction <add>, %59, %cst_28 [1] : vector<8x32xf32> to vector<8xf32>
    %61 = vector.shape_cast %60 : vector<8xf32> to vector<8x1xf32>
    %cst_29 = arith.constant 3.200000e+01 : f32
    %62 = vector.broadcast %cst_29 : f32 to vector<8x1xf32>
    %63 = arith.divf %61, %62 : vector<8x1xf32>
    %64 = vector.broadcast %56 : vector<8x1xf32> to vector<8x32xf32>
    %65 = arith.subf %50, %64 : vector<8x32xf32>
    %cst_30 = arith.constant 9.99999974E-6 : f32
    %66 = vector.broadcast %cst_30 : f32 to vector<8x1xf32>
    %67 = arith.addf %63, %66 : vector<8x1xf32>
    %68 = math.rsqrt %67 : vector<8x1xf32>
    %69 = vector.broadcast %68 : vector<8x1xf32> to vector<8x32xf32>
    %70 = arith.mulf %65, %69 : vector<8x32xf32>
    %71 = vector.broadcast %51 : vector<1x32xf32> to vector<8x32xf32>
    %72 = arith.mulf %70, %71 : vector<8x32xf32>
    %73 = vector.broadcast %52 : vector<1x32xf32> to vector<8x32xf32>
    %74 = arith.addf %72, %73 : vector<8x32xf32>
    %c0_31 = arith.constant 0 : index
    %c0_32 = arith.constant 0 : index
    %75 = vector.load %arg8[%c0_31, %c0_32] : memref<32x8xf32, #tpu.memory_space<vmem>>, vector<32x8xf32>
    %cst_33 = arith.constant dense<0.000000e+00> : vector<8x8xf32>
    %76 = tpu.matmul %49, %75, %cst_33 {dimension_numbers = #tpu.dot_dimension_numbers<[1], [0], [0], [1], [0, 0, 1, 1], [], []>} : vector<8x32xf32>, vector<32x8xf32>, vector<8x8xf32> -> vector<8x8xf32>
    %c0_34 = arith.constant 0 : index
    %c0_35 = arith.constant 0 : index
    %77 = vector.load %arg9[%c0_34, %c0_35] : memref<32x8xf32, #tpu.memory_space<vmem>>, vector<32x8xf32>
    %cst_36 = arith.constant dense<0.000000e+00> : vector<8x8xf32>
    %78 = tpu.matmul %74, %77, %cst_36 {dimension_numbers = #tpu.dot_dimension_numbers<[1], [0], [0], [1], [0, 0, 1, 1], [], []>} : vector<8x32xf32>, vector<32x8xf32>, vector<8x8xf32> -> vector<8x8xf32>
    %c0_37 = arith.constant 0 : index
    %c0_38 = arith.constant 0 : index
    %79 = vector.load %arg7[%c0_37, %c0_38] : memref<32x512xf32, #tpu.memory_space<vmem>>, vector<32x512xf32>
    %cst_39 = arith.constant dense<0.000000e+00> : vector<8x512xf32>
    %80 = tpu.matmul %24, %79, %cst_39 {dimension_numbers = #tpu.dot_dimension_numbers<[1], [0], [0], [1], [0, 0, 1, 1], [], []>} : vector<8x32xf32>, vector<32x512xf32>, vector<8x512xf32> -> vector<8x512xf32>
    %cst_40 = arith.constant 0.000000e+00 : f32
    %81 = vector.broadcast %cst_40 : f32 to vector<8x64xf32>
    %82 = vector.extract_strided_slice %76 {offsets = [0, 0], sizes = [8, 1], strides = [1, 1]} : vector<8x8xf32> to vector<8x1xf32>
    %83 = vector.extract_strided_slice %80 {offsets = [0, 0], sizes = [8, 64], strides = [1, 1]} : vector<8x512xf32> to vector<8x64xf32>
    %84 = vector.broadcast %82 : vector<8x1xf32> to vector<8x64xf32>
    %85 = arith.mulf %84, %83 : vector<8x64xf32>
    %86 = arith.addf %81, %85 : vector<8x64xf32>
    %87 = vector.extract_strided_slice %76 {offsets = [0, 1], sizes = [8, 1], strides = [1, 1]} : vector<8x8xf32> to vector<8x1xf32>
    %88 = vector.extract_strided_slice %80 {offsets = [0, 64], sizes = [8, 64], strides = [1, 1]} : vector<8x512xf32> to vector<8x64xf32>
    %89 = vector.broadcast %87 : vector<8x1xf32> to vector<8x64xf32>
    %90 = arith.mulf %89, %88 : vector<8x64xf32>
    %91 = arith.addf %86, %90 : vector<8x64xf32>
    %92 = vector.extract_strided_slice %76 {offsets = [0, 2], sizes = [8, 1], strides = [1, 1]} : vector<8x8xf32> to vector<8x1xf32>
    %93 = vector.extract_strided_slice %80 {offsets = [0, 128], sizes = [8, 64], strides = [1, 1]} : vector<8x512xf32> to vector<8x64xf32>
    %94 = vector.broadcast %92 : vector<8x1xf32> to vector<8x64xf32>
    %95 = arith.mulf %94, %93 : vector<8x64xf32>
    %96 = arith.addf %91, %95 : vector<8x64xf32>
    %97 = vector.extract_strided_slice %76 {offsets = [0, 3], sizes = [8, 1], strides = [1, 1]} : vector<8x8xf32> to vector<8x1xf32>
    %98 = vector.extract_strided_slice %80 {offsets = [0, 192], sizes = [8, 64], strides = [1, 1]} : vector<8x512xf32> to vector<8x64xf32>
    %99 = vector.broadcast %97 : vector<8x1xf32> to vector<8x64xf32>
    %100 = arith.mulf %99, %98 : vector<8x64xf32>
    %101 = arith.addf %96, %100 : vector<8x64xf32>
    %102 = vector.extract_strided_slice %76 {offsets = [0, 4], sizes = [8, 1], strides = [1, 1]} : vector<8x8xf32> to vector<8x1xf32>
    %103 = vector.extract_strided_slice %80 {offsets = [0, 256], sizes = [8, 64], strides = [1, 1]} : vector<8x512xf32> to vector<8x64xf32>
    %104 = vector.broadcast %102 : vector<8x1xf32> to vector<8x64xf32>
    %105 = arith.mulf %104, %103 : vector<8x64xf32>
    %106 = arith.addf %101, %105 : vector<8x64xf32>
    %107 = vector.extract_strided_slice %76 {offsets = [0, 5], sizes = [8, 1], strides = [1, 1]} : vector<8x8xf32> to vector<8x1xf32>
    %108 = vector.extract_strided_slice %80 {offsets = [0, 320], sizes = [8, 64], strides = [1, 1]} : vector<8x512xf32> to vector<8x64xf32>
    %109 = vector.broadcast %107 : vector<8x1xf32> to vector<8x64xf32>
    %110 = arith.mulf %109, %108 : vector<8x64xf32>
    %111 = arith.addf %106, %110 : vector<8x64xf32>
    %112 = vector.extract_strided_slice %76 {offsets = [0, 6], sizes = [8, 1], strides = [1, 1]} : vector<8x8xf32> to vector<8x1xf32>
    %113 = vector.extract_strided_slice %80 {offsets = [0, 384], sizes = [8, 64], strides = [1, 1]} : vector<8x512xf32> to vector<8x64xf32>
    %114 = vector.broadcast %112 : vector<8x1xf32> to vector<8x64xf32>
    %115 = arith.mulf %114, %113 : vector<8x64xf32>
    %116 = arith.addf %111, %115 : vector<8x64xf32>
    %117 = vector.extract_strided_slice %76 {offsets = [0, 7], sizes = [8, 1], strides = [1, 1]} : vector<8x8xf32> to vector<8x1xf32>
    %118 = vector.extract_strided_slice %80 {offsets = [0, 448], sizes = [8, 64], strides = [1, 1]} : vector<8x512xf32> to vector<8x64xf32>
    %119 = vector.broadcast %117 : vector<8x1xf32> to vector<8x64xf32>
    %120 = arith.mulf %119, %118 : vector<8x64xf32>
    %121 = arith.addf %116, %120 : vector<8x64xf32>
    %cst_41 = arith.constant 0.000000e+00 : f32
    %122 = vector.broadcast %cst_41 : f32 to vector<8x8xf32>
    %123 = vector.extract_strided_slice %78 {offsets = [0, 0], sizes = [8, 1], strides = [1, 1]} : vector<8x8xf32> to vector<8x1xf32>
    %124 = vector.extract_strided_slice %121 {offsets = [0, 0], sizes = [8, 8], strides = [1, 1]} : vector<8x64xf32> to vector<8x8xf32>
    %125 = vector.broadcast %123 : vector<8x1xf32> to vector<8x8xf32>
    %126 = arith.mulf %125, %124 : vector<8x8xf32>
    %127 = arith.addf %122, %126 : vector<8x8xf32>
    %128 = vector.extract_strided_slice %78 {offsets = [0, 1], sizes = [8, 1], strides = [1, 1]} : vector<8x8xf32> to vector<8x1xf32>
    %129 = vector.extract_strided_slice %121 {offsets = [0, 8], sizes = [8, 8], strides = [1, 1]} : vector<8x64xf32> to vector<8x8xf32>
    %130 = vector.broadcast %128 : vector<8x1xf32> to vector<8x8xf32>
    %131 = arith.mulf %130, %129 : vector<8x8xf32>
    %132 = arith.addf %127, %131 : vector<8x8xf32>
    %133 = vector.extract_strided_slice %78 {offsets = [0, 2], sizes = [8, 1], strides = [1, 1]} : vector<8x8xf32> to vector<8x1xf32>
    %134 = vector.extract_strided_slice %121 {offsets = [0, 16], sizes = [8, 8], strides = [1, 1]} : vector<8x64xf32> to vector<8x8xf32>
    %135 = vector.broadcast %133 : vector<8x1xf32> to vector<8x8xf32>
    %136 = arith.mulf %135, %134 : vector<8x8xf32>
    %137 = arith.addf %132, %136 : vector<8x8xf32>
    %138 = vector.extract_strided_slice %78 {offsets = [0, 3], sizes = [8, 1], strides = [1, 1]} : vector<8x8xf32> to vector<8x1xf32>
    %139 = vector.extract_strided_slice %121 {offsets = [0, 24], sizes = [8, 8], strides = [1, 1]} : vector<8x64xf32> to vector<8x8xf32>
    %140 = vector.broadcast %138 : vector<8x1xf32> to vector<8x8xf32>
    %141 = arith.mulf %140, %139 : vector<8x8xf32>
    %142 = arith.addf %137, %141 : vector<8x8xf32>
    %143 = vector.extract_strided_slice %78 {offsets = [0, 4], sizes = [8, 1], strides = [1, 1]} : vector<8x8xf32> to vector<8x1xf32>
    %144 = vector.extract_strided_slice %121 {offsets = [0, 32], sizes = [8, 8], strides = [1, 1]} : vector<8x64xf32> to vector<8x8xf32>
    %145 = vector.broadcast %143 : vector<8x1xf32> to vector<8x8xf32>
    %146 = arith.mulf %145, %144 : vector<8x8xf32>
    %147 = arith.addf %142, %146 : vector<8x8xf32>
    %148 = vector.extract_strided_slice %78 {offsets = [0, 5], sizes = [8, 1], strides = [1, 1]} : vector<8x8xf32> to vector<8x1xf32>
    %149 = vector.extract_strided_slice %121 {offsets = [0, 40], sizes = [8, 8], strides = [1, 1]} : vector<8x64xf32> to vector<8x8xf32>
    %150 = vector.broadcast %148 : vector<8x1xf32> to vector<8x8xf32>
    %151 = arith.mulf %150, %149 : vector<8x8xf32>
    %152 = arith.addf %147, %151 : vector<8x8xf32>
    %153 = vector.extract_strided_slice %78 {offsets = [0, 6], sizes = [8, 1], strides = [1, 1]} : vector<8x8xf32> to vector<8x1xf32>
    %154 = vector.extract_strided_slice %121 {offsets = [0, 48], sizes = [8, 8], strides = [1, 1]} : vector<8x64xf32> to vector<8x8xf32>
    %155 = vector.broadcast %153 : vector<8x1xf32> to vector<8x8xf32>
    %156 = arith.mulf %155, %154 : vector<8x8xf32>
    %157 = arith.addf %152, %156 : vector<8x8xf32>
    %158 = vector.extract_strided_slice %78 {offsets = [0, 7], sizes = [8, 1], strides = [1, 1]} : vector<8x8xf32> to vector<8x1xf32>
    %159 = vector.extract_strided_slice %121 {offsets = [0, 56], sizes = [8, 8], strides = [1, 1]} : vector<8x64xf32> to vector<8x8xf32>
    %160 = vector.broadcast %158 : vector<8x1xf32> to vector<8x8xf32>
    %161 = arith.mulf %160, %159 : vector<8x8xf32>
    %162 = arith.addf %157, %161 : vector<8x8xf32>
    %c0_42 = arith.constant 0 : index
    %c0_43 = arith.constant 0 : index
    %163 = vector.load %arg10[%c0_42, %c0_43] : memref<8x8xf32, #tpu.memory_space<vmem>>, vector<8x8xf32>
    tpu.vector_store %arg10[%c0_42, %c0_43], %162 {strides = array<i32>} : memref<8x8xf32, #tpu.memory_space<vmem>>, vector<8x8xf32>,
    return
  }
}

</mosaic_0001>

<bundles_post_ra>
// kernel: tpu_custom_call.1
= control target key start
LH: loop header
LB: loop body
LE: loop exit
PB: predicated region body
PF: predicated region fallthrough
CT: control target
= control target key end

     0   :  { %15 = vsyncpa [#allocation3], 0  ;;  %s944_s0 = inlined_call_operand.vmem [shape: f32[8,32], index: 0, kind: input, shape index: {}]   ;;  %s945_s1 = inlined_call_operand.vmem [shape: f32[8,32], index: 1, kind: input, shape index: {}]   ;;  %s946_s2 = inlined_call_operand.vmem [shape: f32[8,32], index: 2, kind: input, shape index: {}]   ;;  %s947_s3 = inlined_call_operand.vmem [shape: f32[1,32], index: 3, kind: input, shape index: {}]   ;;  %s948_s4 = inlined_call_operand.vmem [shape: f32[1,32], index: 4, kind: input, shape index: {}]   ;;  %s949_s5 = inlined_call_operand.vmem [shape: f32[1,32], index: 5, kind: input, shape index: {}]   ;;  %s950_s6 = inlined_call_operand.vmem [shape: f32[1,32], index: 6, kind: input, shape index: {}]   ;;  %s951_s7 = inlined_call_operand.hbm [shape: f32[32,512], index: 7, kind: input, shape index: {}]   ;;  %s952_s8 = inlined_call_operand.vmem [shape: f32[32,8], index: 8, kind: input, shape index: {}]   ;;  %s953_s9 = inlined_call_operand.vmem [shape: f32[32,8], index: 9, kind: input, shape index: {}]   ;;  %s954_s10 = inlined_call_operand.hbm [shape: f32[8,8], index: 10, kind: output, shape index: {}]  }
   0x1   :  { %16 = vsyncpa [#allocation4], 0  ;;  %s764_s13 = smov [#allocation2]   ;;  %s716_s17 = scalar_lea.hbm %s951_s7, 2048 }
   0x2   :  { %s36_s14 = sshll.u32 %s764_s13, 4  ;;  %p717_p0 = scmp.ne.s32.totalorder %s951_s7, %s716_s17  ;;  %s37_s14 = int_to_ptr.vmem [resolvable:$true] %s36_s14 }
   0x3   :  { %p720_p1 = scmp.lt.u32.totalorder %s716_s17, %s951_s7 }
   0x5   :  { %p722_p2 = pnand %p720_p1, %p717_p0 }
   0x7   :  { %725 = shalt.err (!%p722_p2)
}
   0x8   :  { %s726_s22 = scalar_lea.vmem %s37_s14, 2048  ;;  %p731_p4 = scmp.lt.s32.totalorder %s37_s14, %s37_s14 }
   0x9   :  { %p727_p3 = scmp.ne.s32.totalorder %s37_s14, %s726_s22  ;;  %p732_p5 = scmp.lt.s32.totalorder %s726_s22, %s726_s22 }
   0xb   :  { %p733_p6 = por %p732_p5, %p731_p4 }
   0xd   :  { %p734_p7 = pnand %p733_p6, %p727_p3 }
   0xf   :  { %737 = shalt.err (!%p734_p7)
}
  0x10   :  { %s765_s23 = smov 512   ;;  %s766_s24 = smov 32  }
  0x11   :  { %42 = dma.hbm_to_vmem [thread:$0]  %s951_s7, 2048, %s37_s14, [#allocation3], %s765_s23, %s765_s23, %s766_s24  }
  0x12   :  { %760 = dma.done.wait [#allocation3], 2048  }
  0x13   :  { %761 = vsyncadd [#allocation3], 4294965248  ;;  %vm53_vm0 = vcmask 261120   ;;  %v82_v0 = vld [vmem:[%s945_s1] sm:$0xff]  ;;  %v129_v22 = vld [vmem:[%s952_s8 + $0x8] sm:$0xff]  ;;  %v767_v24 = vmov 0.0|0.0  }
  0x14   :  { %v112_v1 = vld [vmem:[%s946_s2] sm:$0xff]  ;;  %v85_v3 = vsel %vm53_vm0, %v82_v0, 0.0  ;;  %642 = vmatprep.subr.bf16.mxu0 %v767_v24  ;;  %648 = vmatprep.subr.bf16.mxu1 %v767_v24  ;;  %v130_v25 = vld [vmem:[%s952_s8 + $0x10] sm:$0xff]  ;;  %v131_v26 = vld [vmem:[%s952_s8 + $0x18] sm:$0xff]  ;;  %vm768_vm1 = vmmov 0   ;;  %v769_v37 = vmov 0.0  }
  0x15   :  { %v50_v2 = vld [vmem:[%s944_s0] sm:$0xff]  ;;  %v113_v4 = vsel %vm53_vm0, %v112_v1, 0.0  ;;  %86 = vadd.xlane.f32.xlu0 %v85_v3  ;;  %v646_v28 = vpack.c.bf16 %v131_v26, %v130_v25  ;;  %v206_v29 = vld [vmem:[%s953_s9 + $0x8] sm:$0xff]  ;;  %v207_v34 = vld [vmem:[%s953_s9 + $0x10] sm:$0xff]  ;;  %628 = vmatprep.mubr.msk.f32.mxu0 %vm768_vm1, %v769_v37  ;;  %v770_v41 = vmov 3   ;;  %v771_v42 = vmov 1  }
  0x16   :  { %114 = vadd.xlane.f32.xlu1 %v113_v4  ;;  %v54_v5 = vsel %vm53_vm0, %v50_v2, 0.0  ;;  %v128_v21 = vld [vmem:[%s952_s8] sm:$0xff]  ;;  %v283_v31 = vld [vmem:[#allocation2 + $0x8] sm:$0xff]  ;;  %v208_v35 = vld [vmem:[%s953_s9 + $0x18] sm:$0xff]  ;;  %639 = vmatprep.mubr.msk.f32.mxu1 %vm768_vm1, %v769_v37  ;;  %v772_v25 = vmov 5   ;;  %s780_s29 = smov 104  }
  0x17   :  { %v643_v23 = vpack.c.bf16 %v129_v22, %v128_v21  ;;  %v205_v27 = vld [vmem:[%s953_s9] sm:$0xff]  ;;  %v287_v32 = vld [vmem:[#allocation2 + $0x28] sm:$0xff]  ;;  %v652_v36 = vpack.c.bf16 %v208_v35, %v207_v34  ;;  %v285_v38 = vld [vmem:[#allocation2 + $0x18] sm:$0xff]  ;;  %694 = vset.pattern.permute.xlu1 %v770_v41  ;;  %693 = vset.pattern.permute.xlu0 %v771_v42  ;;  %v776_v34 = vmov 4   ;;  %v777_v35 = vmov 6   ;;  %s781_s30 = smov 112  }
  0x18   :  { %v649_v30 = vpack.c.bf16 %v206_v29, %v205_v27  ;;  %v654_v33 = vpack.c.bf16 %v287_v32, %v283_v31  ;;  %v289_v39 = vld [vmem:[#allocation2 + $0x38] sm:$0xff]  ;;  %v604_v53 = vld [vmem:[%s949_s5] ss:$0 sm:$0xff]  ;;  %v291_v58 = vld [vmem:[#allocation2 + $0x48] sm:$0xff]  ;;  %v773_v29 = vmov 7   ;;  %v774_v32 = vmov 0  }
  0x19   :  { %55 = vadd.xlane.f32.xlu0 %v54_v5  ;;  %644 = vmatpush3.bf16.msra.mxu0 %v643_v23  ;;  %v662_v40 = vpack.c.bf16 %v289_v39, %v285_v38  ;;  %v282_v55 = vld [vmem:[#allocation2] sm:$0xff]  ;;  %v295_v59 = vld [vmem:[#allocation2 + $0x68] sm:$0xff]  ;;  %v284_v5 = vld [vmem:[#allocation2 + $0x10] sm:$0xff]  ;;  %s782_s11 = smov 88   ;;  %s783_s12 = smov 96   ;;  %vm585_vm2 = vcmask 64512  }
  0x1a   :  { %645 = vmatprep.subr.bf16.mxu0 %v767_v24  ;;  %650 = vmatpush3.bf16.msra.mxu1 %v649_v30  ;;  %v286_v56 = vld [vmem:[#allocation2 + $0x20] sm:$0xff]  ;;  %s784_s0 = smov 72   ;;  %s785_s1 = smov 80  }
  0x1b   :  { %651 = vmatprep.subr.bf16.mxu1 %v767_v24  ;;  %v605_v57 = vld [vmem:[%s950_s6] ss:$0 sm:$0xff]  ;;  %v656_v62 = vpack.c.bf16 %v286_v56, %v282_v55  ;;  %s786_s2 = smov [#allocation5]  }
  0x1c   :  { %v290_v63 = vld [vmem:[#allocation2 + $0x40] sm:$0xff]  ;;  %s593_s7 = sshll.u32 %s786_s2, 4  ;;  %s594_s7 = int_to_ptr.vmem [resolvable:$true] %s593_s7 }
  0x1d   :  { %647 = vmatpush3.bf16.msra.mxu0 %v646_v28  ;;  %v294_v4 = vld [vmem:[#allocation2 + $0x60] sm:$0xff]  ;;  %s738_s13 = scalar_lea.vmem %s594_s7, 128  ;;  %p743_p9 = scmp.lt.s32.totalorder %s594_s7, %s594_s7 }
  0x1e   :  { %655 = vmatprep.subr.bf16.mxu0 %v654_v33  ;;  %653 = vmatpush3.bf16.msra.mxu1 %v652_v36  ;;  %v775_v33 = vmov 2   ;;  %p739_p8 = scmp.ne.s32.totalorder %s594_s7, %s738_s13  ;;  %p744_p10 = scmp.lt.s32.totalorder %s738_s13, %s738_s13 }
  0x1f   :  { %663 = vmatprep.subr.bf16.mxu1 %v662_v40 }
  0x20   :  { %p745_p11 = por %p744_p10, %p743_p9 }
  0x22   :  { %p746_p12 = pnand %p745_p11, %p739_p8 }
  0xa2   :  { %v87_v6 = vpop.xlane.xlu0 %86 }
  0xa3   :  { %v115_v7 = vpop.xlane.xlu1 %114  ;;  %v88_v8 = vmul.f32 0.03125, %v87_v6  ;;  %v288_v6 = vld [vmem:[#allocation2 + $0x30] sm:$0xff] }
  0xa4   :  { %v116_v9 = vmul.f32 0.03125, %v115_v7 }
  0xa5   :  { %v866_v10 = vsub.f32 %v82_v0, %v88_v8  ;;  %v602_v8 = vld [vmem:[%s947_s3] ss:$0 sm:$0xff]  ;;  %s778_s3 = smov 64  }
  0xa6   :  { %v868_v11 = vsub.f32 %v112_v1, %v116_v9  ;;  %v56_v12 = vpop.xlane.xlu0 %55  ;;  %v293_v9 = vld [vmem:[#allocation2 + $0x58] sm:$0xff] }
  0xa7   :  { %v58_v13 = vmul.f32 0.03125, %v56_v12  ;;  %v90_v14 = vmul.f32 %v866_v10, %v866_v10 }
  0xa8   :  { %v118_v15 = vmul.f32 %v868_v11, %v868_v11 }
  0xa9   :  { %v874_v16 = vsub.f32 %v50_v2, %v58_v13  ;;  %v91_v17 = vsel %vm53_vm0, %v90_v14, 0.0  ;;  %v658_v2 = vpack.c.bf16 %v295_v59, %v291_v58  ;;  %v660_v13 = vpack.c.bf16 %v294_v4, %v290_v63 }
  0xaa   :  { %92 = vadd.xlane.f32.xlu1 %v91_v17  ;;  %v119_v18 = vsel %vm53_vm0, %v118_v15, 0.0  ;;  %v664_v14 = vpack.c.bf16 %v288_v6, %v284_v5 }
  0xab   :  { %v60_v19 = vmul.f32 %v874_v16, %v874_v16 }
  0xad   :  { %v61_v20 = vsel %vm53_vm0, %v60_v19, 0.0  ;;  %v603_v19 = vld [vmem:[%s948_s4] ss:$0 sm:$0xff]  ;;  %s779_s4 = smov 120  }
  0xae   :  { %120 = vadd.xlane.f32.xlu1 %v119_v18  ;;  %62 = vadd.xlane.f32.xlu0 %v61_v20  ;;  %v292_v18 = vld [vmem:[#allocation2 + $0x50] sm:$0xff] }
 0x137   :  { %v93_v43 = vpop.xlane.xlu1 %92 }
 0x138   :  { %v94_v44 = vmul.f32 0.03125, %v93_v43 }
 0x13a   :  { %v95_v45 = vadd.f32 1e-05, %v94_v44 }
 0x13b   :  { %v121_v46 = vpop.xlane.xlu1 %120  ;;  %v63_v47 = vpop.xlane.xlu0 %62 }
 0x13c   :  { %710 = vrsqrt.f32 %v95_v45  ;;  %v122_v48 = vmul.f32 0.03125, %v121_v46  ;;  %v64_v49 = vmul.f32 0.03125, %v63_v47 }
 0x13e   :  { %v123_v50 = vadd.f32 1e-05, %v122_v48  ;;  %v65_v51 = vadd.f32 1e-05, %v64_v49 }
 0x140   :  { %712 = vrsqrt.f32 %v123_v50 }
 0x141   :  { %714 = vrsqrt.f32 %v65_v51 }
 0x146   :  { %v711_v52 = vpop.eup %710 }
 0x147   :  { %v97_v54 = vmul.f32 %v711_v52, %v866_v10  ;;  %v297_v10 = vld [vmem:[#allocation2 + $0x78] sm:$0xff] }
 0x148   :  { %v666_v17 = vpack.c.bf16 %v297_v10, %v293_v9 }
 0x149   :  { %v104_v60 = vmul.f32 %v604_v53, %v97_v54 }
 0x14a   :  { %v713_v61 = vpop.eup %712 }
 0x14b   :  { %v715_v0 = vpop.eup %714  ;;  %v111_v1 = vadd.f32 %v605_v57, %v104_v60  ;;  %v125_v3 = vmul.f32 %v713_v61, %v868_v11 }
 0x14c   :  { %v67_v7 = vmul.f32 %v715_v0, %v874_v16  ;;  %v296_v16 = vld [vmem:[#allocation2 + $0x70] sm:$0xff] }
 0x14d   :  { %629 = vmatmul.mubr.msk.f32.vlgmr.msra.gmra.mrb[0].mxu0 %vm53_vm0, %v111_v1  ;;  %v126_v12 = vmul.f32 %v604_v53, %v125_v3  ;;  %v668_v20 = vpack.c.bf16 %v296_v16, %v292_v18 }
 0x14e   :  { %657 = vmatpush1.bf16.msra.mxu0 %v656_v62  ;;  %365 = vmatprep.mubr.f32.mxu0 %v769_v37  ;;  %v74_v15 = vmul.f32 %v602_v8, %v67_v7 }
 0x14f   :  { %659 = vmatprep.subr.bf16.mxu0 %v658_v2  ;;  %v127_v11 = vadd.f32 %v605_v57, %v126_v12 }
 0x150   :  { %v81_v21 = vadd.f32 %v603_v19, %v74_v15 }
 0x151   :  { %640 = vmatmul.mubr.msk.f32.vlgmr.msra.gmra.mrb[0].mxu1 %vm53_vm0, %v127_v11 }
 0x152   :  { %661 = vmatpush1.bf16.msra.mxu0 %v660_v13  ;;  %665 = vmatpush1.bf16.msra.mxu1 %v664_v14 }
 0x153   :  { %667 = vmatprep.subr.bf16.mxu1 %v666_v17  ;;  %436 = vmatprep.mubr.f32.mxu1 %v769_v37 }
 0x155   :  { %608 = vmatmul.mubr.msk.f32.vlgmr.msra.gmra.mrb[2].mxu0 %vm53_vm0, %v81_v21 }
 0x156   :  { %669 = vmatpush1.bf16.msra.mxu1 %v668_v20 }
 0x159   :  { %609 = vmatmul.mubr.msk.f32.vlgmr.msra.gmra.mrb[2].mxu1 %vm53_vm0, %v81_v21 }
 0x220   :  { %v201_v22 = vpop.f32.mrb[0].mxu0 }
 0x221   :  { %467 = vperm.xlu1 %694, %v201_v22   ;;  %v630_v23 = vpop.f32.mrb[1].mxu0  ;;  %451 = vperm.xlu0 %693, %v201_v22  }
 0x224   :  { %v278_v24 = vpop.f32.mrb[0].mxu1 }
 0x225   :  { %695 = vset.pattern.permute.xlu1 %v772_v25  ;;  %v641_v26 = vpop.f32.mrb[1].mxu1  ;;  %703 = vset.pattern.permute.xlu0 %v770_v41 }
 0x226   :  { %483 = vperm.xlu1 %695, %v201_v22  }
 0x228   :  { %v367_v27 = vpop.f32.mrb[2].mxu0 }
 0x229   :  { %v369_v28 = vpop.f32.mrb[3].mxu0 }
 0x22a   :  { %696 = vset.pattern.permute.xlu1 %v773_v29 }
 0x22b   :  { %499 = vperm.xlu1 %696, %v201_v22  }
 0x22c   :  { %v438_v30 = vpop.f32.mrb[2].mxu1 }
 0x22d   :  { %v440_v31 = vpop.f32.mrb[3].mxu1 }
 0x22f   :  { %697 = vset.pattern.permute.xlu1 %v774_v32 }
 0x230   :  { %445 = vperm.xlu1 %697, %v201_v22  }
 0x234   :  { %698 = vset.pattern.permute.xlu1 %v775_v33 }
 0x235   :  { %461 = vperm.xlu1 %698, %v201_v22  }
 0x239   :  { %699 = vset.pattern.permute.xlu1 %v776_v34 }
 0x23a   :  { %477 = vperm.xlu1 %699, %v201_v22  }
 0x23e   :  { %700 = vset.pattern.permute.xlu1 %v777_v35 }
 0x23f   :  { %493 = vperm.xlu1 %700, %v201_v22  }
 0x243   :  { %701 = vset.pattern.permute.xlu1 %v771_v42 }
 0x244   :  { %516 = vperm.xlu1 %701, %v278_v24  }
 0x248   :  { %702 = vset.pattern.permute.xlu1 %v775_v33 }
 0x2a0   :  { %v468_v36 = vpop.permute.xlu1 %467  ;;  %v452_v37 = vpop.permute.xlu0 %451 }
 0x2a1   :  { %v470_v38 = vmul.f32 %v468_v36, %v369_v28  ;;  %v454_v39 = vmul.f32 %v452_v37, %v367_v27 }
 0x2a3   :  { %472 = vrot.lane.b32.xlu0 %v470_v38, %s778_s3  ;;  %456 = vrot.lane.b32.xlu1 %v454_v39, %s778_s3 }
 0x2a5   :  { %v484_v40 = vpop.permute.xlu1 %483 }
 0x2a6   :  { %v486_v41 = vmul.f32 %v484_v40, %v438_v30 }
 0x2a7   :  { %526 = vperm.xlu1 %702, %v278_v24  }
 0x2a8   :  { %488 = vrot.lane.b32.xlu0 %v486_v41, %s778_s3 }
 0x2aa   :  { %v500_v43 = vpop.permute.xlu1 %499 }
 0x2ab   :  { %704 = vset.pattern.permute.xlu1 %v776_v34  ;;  %v502_v44 = vmul.f32 %v500_v43, %v440_v31 }
 0x2ac   :  { %536 = vperm.xlu0 %703, %v278_v24   ;;  %546 = vperm.xlu1 %704, %v278_v24  }
 0x2af   :  { %v446_v42 = vpop.permute.xlu1 %445 }
 0x2b0   :  { %705 = vset.pattern.permute.xlu0 %v772_v25  ;;  %504 = vrot.lane.b32.xlu1 %v502_v44, %s778_s3  ;;  %v448_v49 = vmul.f32 %v446_v42, %v367_v27 }
 0x2b1   :  { %556 = vperm.xlu0 %705, %v278_v24   ;;  %706 = vset.pattern.permute.xlu1 %v777_v35 }
 0x2b4   :  { %566 = vperm.xlu1 %706, %v278_v24   ;;  %v462_v45 = vpop.permute.xlu1 %461 }
 0x2b5   :  { %708 = vset.pattern.permute.xlu0 %v774_v32  ;;  %v464_v51 = vmul.f32 %v462_v45, %v369_v28 }
 0x2b6   :  { %510 = vperm.xlu0 %708, %v278_v24  }
 0x2b8   :  { %707 = vset.pattern.permute.xlu1 %v773_v29 }
 0x2b9   :  { %576 = vperm.xlu1 %707, %v278_v24   ;;  %v478_v46 = vpop.permute.xlu1 %477 }
 0x2ba   :  { %709 = vset.pattern.permute.xlu0 %v773_v29  ;;  %v480_v55 = vmul.f32 %v478_v46, %v438_v30 }
 0x2be   :  { %v494_v47 = vpop.permute.xlu1 %493 }
 0x2bf   :  { %v496_v59 = vmul.f32 %v494_v47, %v440_v31 }
 0x2c3   :  { %v517_v48 = vpop.permute.xlu1 %516 }
 0x315   :  { %v457_v50 = vpop.permute.xlu1 %456  ;;  %v473_v53 = vpop.permute.xlu0 %472 }
 0x316   :  { %v459_v52 = vadd.f32 %v457_v50, %v448_v49 }
 0x318   :  { %v465_v54 = vadd.f32 %v464_v51, %v459_v52 }
 0x31a   :  { %v475_v56 = vadd.f32 %v473_v53, %v465_v54  ;;  %v489_v58 = vpop.permute.xlu0 %488 }
 0x31c   :  { %v481_v57 = vadd.f32 %v480_v55, %v475_v56 }
 0x31e   :  { %v491_v60 = vadd.f32 %v489_v58, %v481_v57 }
 0x320   :  { %v497_v61 = vadd.f32 %v496_v59, %v491_v60 }
 0x326   :  { %v527_v62 = vpop.permute.xlu1 %526 }
 0x32b   :  { %v547_v63 = vpop.permute.xlu1 %546  ;;  %v537_v0 = vpop.permute.xlu0 %536 }
 0x32f   :  { %v505_v1 = vpop.permute.xlu1 %504 }
 0x330   :  { %v507_v2 = vadd.f32 %v505_v1, %v497_v61  ;;  %v557_v5 = vpop.permute.xlu0 %556 }
 0x332   :  { %v519_v3 = vmul.f32 %v517_v48, %v507_v2  ;;  %v539_v4 = vmul.f32 %v537_v0, %v507_v2  ;;  %v559_v7 = vmul.f32 %v557_v5, %v507_v2  ;;  %v529_v8 = vmul.f32 %v527_v62, %v507_v2 }
 0x333   :  { %v567_v6 = vpop.permute.xlu1 %566  ;;  %v549_v12 = vmul.f32 %v547_v63, %v507_v2 }
 0x334   :  { %521 = vrot.lane.b32.xlu1 %v519_v3, %s779_s4  ;;  %541 = vrot.lane.b32.xlu0 %v539_v4, %s780_s29  ;;  %v569_v13 = vmul.f32 %v567_v6, %v507_v2 }
 0x335   :  { %v511_v14 = vpop.permute.xlu0 %510 }
 0x336   :  { %v513_v15 = vmul.f32 %v511_v14, %v507_v2 }
 0x338   :  { %v577_v9 = vpop.permute.xlu1 %576  ;;  %531 = vrot.lane.b32.xlu1 %v529_v8, %s781_s30  ;;  %561 = vrot.lane.b32.xlu0 %v559_v7, %s782_s11 }
 0x339   :  { %v579_v10 = vmul.f32 %v577_v9, %v507_v2 }
 0x33c   :  { %551 = vrot.lane.b32.xlu1 %v549_v12, %s783_s12  ;;  %581 = vrot.lane.b32.xlu0 %v579_v10, %s784_s0 }
 0x340   :  { %571 = vrot.lane.b32.xlu1 %v569_v13, %s785_s1 }
 0x3a6   :  { %v522_v11 = vpop.permute.xlu1 %521  ;;  %v542_v17 = vpop.permute.xlu0 %541 }
 0x3a7   :  { %v524_v18 = vadd.f32 %v522_v11, %v513_v15 }
 0x3aa   :  { %v532_v16 = vpop.permute.xlu1 %531  ;;  %v562_v21 = vpop.permute.xlu0 %561 }
 0x3ab   :  { %v534_v19 = vadd.f32 %v532_v16, %v524_v18 }
 0x3ad   :  { %v544_v20 = vadd.f32 %v542_v17, %v534_v19 }
 0x3ae   :  { %v552_v22 = vpop.permute.xlu1 %551  ;;  %v582_v27 = vpop.permute.xlu0 %581 }
 0x3af   :  { %v554_v23 = vadd.f32 %v552_v22, %v544_v20 }
 0x3b1   :  { %v564_v24 = vadd.f32 %v562_v21, %v554_v23 }
 0x3b2   :  { %v572_v25 = vpop.permute.xlu1 %571 }
 0x3b3   :  { %v574_v26 = vadd.f32 %v572_v25, %v564_v24 }
 0x3b5   :  { %v584_v28 = vadd.f32 %v582_v27, %v574_v26 }
 0x3b7   :  { %586 = vst.msk [vmem:[#allocation5] sm:$0xff] %vm585_vm2, %v584_v28 }
 0x3b8   :  { %749 = shalt.err (!%p746_p12)
}
 0x3b9   :  { %s750_s16 = scalar_lea.hbm %s954_s10, 128 }
 0x3ba   :  { %p751_p13 = scmp.ne.s32.totalorder %s954_s10, %s750_s16  ;;  %p754_p0 = scmp.lt.u32.totalorder %s750_s16, %s954_s10 }
 0x3bc   :  { %p756_p1 = pnand %p754_p0, %p751_p13 }
 0x3be   :  { %759 = shalt.err (!%p756_p1)
}
 0x3bf   :  { %596 = dma.vmem_to_hbm [thread:$0]  %s594_s7, 128, %s954_s10, [#allocation4]  }
 0x3c0   :  { %762 = dma.done.wait [#allocation4], 128  }
 0x3c1   :  { %763 = vsyncadd [#allocation4], 4294967168 }
 0x3c2   :  { %600 = vsyncpa [#allocation3], 1 }
 0x3c3   :  { %601 = vsyncpa [#allocation4], 1 }

</bundles_post_ra>
